<compile_context>
chip_gen: v5e
topology: v5e:2x2
jax: 0.10.0
libtpu: 0.0.40
codegen_flags: <defaults>
</compile_context>

<pallas_src>
import functools

import jax
import jax.numpy as jnp
from jax import lax
from jax.experimental import pallas as pl
from jax.experimental.pallas import tpu as pltpu


# ---------------------------------------------------------------------------
# Fused kernel: QKV projection + per-head causal attention + output projection
# grid = (B,); each step handles one full (T, C) batch element.
# ---------------------------------------------------------------------------
def mha_fused_kernel(x_ref, wqkv_ref, wproj_ref, bproj_ref, o_ref, attn_ref, *, n_head):
    T = x_ref.shape[1]
    C = x_ref.shape[2]
    hd = C // n_head
    mxu_dtype = wproj_ref.dtype          # bf16 when the wrapper casts, else f32

    x = x_ref[0]                          # (T, C)

    # --- one lane-dense matmul for q, k, v of every head: (T, C) x (C, 3C) ---
    qkv = jnp.dot(x, wqkv_ref[...], preferred_element_type=jnp.float32)   # (T, 3C) f32

    scale = jnp.float32(1.0) / jnp.sqrt(jnp.float32(hd))   # k.shape[-1] ** -0.5

    # Causal mask built once per grid step, shared by every head.
    row = lax.broadcasted_iota(jnp.int32, (T, T), 0)
    col = lax.broadcasted_iota(jnp.int32, (T, T), 1)
    causal = col <= row
    neg_big = jnp.float32(-1e30)

    # --- per-head scaled causal attention (static unroll; H is small) -------
    # Head outputs land in a lane-resident VMEM scratch instead of a concatenate.
    for h in range(n_head):
        qh = qkv[:, h * hd:(h + 1) * hd]                    # (T, hd)
        kh = qkv[:, C + h * hd:C + (h + 1) * hd]
        vh = qkv[:, 2 * C + h * hd:2 * C + (h + 1) * hd]

        # q @ k^T without an explicit transpose: contract the last dims (MXU).
        s = lax.dot_general(qh.astype(mxu_dtype), kh.astype(mxu_dtype),
                            (((1,), (1,)), ((), ())),
                            preferred_element_type=jnp.float32) * scale   # (T, T)
        s = jnp.where(causal, s, neg_big)

        # Numerically stable softmax along the last axis — all f32, exact division.
        s = s - jnp.max(s, axis=-1, keepdims=True)
        p = jnp.exp(s)
        p = p / jnp.sum(p, axis=-1, keepdims=True)

        # TODO(synk): dropout on attention weights skipped (eval-mode identity).
        attn_ref[:, h * hd:(h + 1) * hd] = jnp.dot(
            p.astype(mxu_dtype), vh.astype(mxu_dtype),
            preferred_element_type=jnp.float32)

    # TODO(synk): dropout on concatenated head output skipped (eval-mode identity).

    # --- fused output projection: (T, C) x (C, C) + bias (f32 accumulate) ---
    y = jnp.dot(attn_ref[...].astype(mxu_dtype), wproj_ref[...],
                preferred_element_type=jnp.float32) + bproj_ref[...].astype(jnp.float32)
    o_ref[0] = y.astype(o_ref.dtype)


# ---------------------------------------------------------------------------
# Weight prepack (done once, OUTSIDE the per-call jit — review item: hoist fusion)
# ---------------------------------------------------------------------------
def prepack_qkv_weights(wq, wk, wv):
    """(H, C, hd) x3  ->  fused (C, 3C); columns are [Q heads | K heads | V heads]."""
    H, C, hd = wq.shape

    def heads_to_cols(w):                       # (H, C, hd) -> (C, H*hd)
        return jnp.transpose(w, (1, 0, 2)).reshape(C, H * hd)

    return jnp.concatenate(
        [heads_to_cols(wq), heads_to_cols(wk), heads_to_cols(wv)], axis=-1)


# ---------------------------------------------------------------------------
# Wrapper
# ---------------------------------------------------------------------------
@functools.partial(jax.jit, static_argnames=("n_head", "use_bf16"))
def multi_head_attention(x, w_qkv, w_proj, b_proj, *, n_head, use_bf16=False):
    """x: (B, T, C); w_qkv: (C, 3C) prepacked; w_proj: (C, C); b_proj: (1, C)."""
    B, T, C = x.shape
    assert C % n_head == 0
    hd = C // n_head
    out_dtype = x.dtype

    if use_bf16:
        # bf16 MXU inputs, f32 accumulation; softmax math stays f32 inside the kernel.
        x = x.astype(jnp.bfloat16)
        w_qkv = w_qkv.astype(jnp.bfloat16)
        w_proj = w_proj.astype(jnp.bfloat16)
    b_proj = b_proj.astype(jnp.float32)

    itemsize = jnp.dtype(x.dtype).itemsize
    # Explicit VMEM budget: double-buffered x/out blocks + resident weights + scratch.
    needed = (2 * 2 * T * C * itemsize          # x and out blocks, 2-deep each
              + 4 * C * C * itemsize            # resident W_qkv (C,3C) + W_proj (C,C)
              + C * 4                           # bias (f32)
              + T * C * 4)                      # attn scratch (f32)
    vmem_limit = int(min(100 * 1024 * 1024, max(8 * 1024 * 1024, 4 * needed)))

    flops = B * (2 * T * C * (3 * C)                    # QKV projection
                 + n_head * 2 * (2 * T * T * hd)        # scores + p@v
                 + 2 * T * C * C)                       # output projection
    cost = pl.CostEstimate(
        flops=flops,
        transcendentals=B * n_head * T * T,             # exp in softmax
        bytes_accessed=(2 * B * T * C + 4 * C * C) * itemsize + 4 * C)

    kernel = functools.partial(mha_fused_kernel, n_head=n_head)

    return pl.pallas_call(
        kernel,
        out_shape=jax.ShapeDtypeStruct((B, T, C), out_dtype),
        grid_spec=pltpu.PrefetchScalarGridSpec(
            num_scalar_prefetch=0,
            grid=(B,),
            in_specs=[
                pl.BlockSpec((1, T, C), lambda b: (b, 0, 0)),     # x (per batch element)
                pl.BlockSpec((C, 3 * C), lambda b: (0, 0)),       # fused W_qkv (resident)
                pl.BlockSpec((C, C), lambda b: (0, 0)),           # W_proj (resident)
                pl.BlockSpec((1, C), lambda b: (0, 0)),           # b_proj (resident)
            ],
            out_specs=pl.BlockSpec((1, T, C), lambda b: (b, 0, 0)),  # lane-dense (T, C)
            scratch_shapes=[pltpu.VMEM((T, C), jnp.float32)],        # head-concat scratch
        ),
        compiler_params=pltpu.CompilerParams(
            dimension_semantics=("parallel",),       # multi-TC chips split the batch
            vmem_limit_bytes=vmem_limit),
        cost_estimate=cost,
    )(x, w_qkv, w_proj, b_proj)


# ---------------------------------------------------------------------------
# Pure-JAX reference (HIGHEST precision so it stays true f32 on a real TPU MXU)
# ---------------------------------------------------------------------------
def multi_head_attention_ref(x, wq, wk, wv, w_proj, b_proj):
    B, T, C = x.shape
    H, _, hd = wq.shape
    hp = lax.Precision.HIGHEST
    q = jnp.einsum("btc,hcd->bhtd", x, wq, precision=hp)
    k = jnp.einsum("btc,hcd->bhtd", x, wk, precision=hp)
    v = jnp.einsum("btc,hcd->bhtd", x, wv, precision=hp)
    s = jnp.einsum("bhtd,bhsd->bhts", q, k, precision=hp) * (hd ** -0.5)
    mask = jnp.tril(jnp.ones((T, T), dtype=bool))
    s = jnp.where(mask[None, None], s, -jnp.inf)
    p = jax.nn.softmax(s, axis=-1)
    o = jnp.einsum("bhts,bhsd->bhtd", p, v, precision=hp)
    o = jnp.transpose(o, (0, 2, 1, 3)).reshape(B, T, C)
    return jnp.dot(o, w_proj, precision=hp) + b_proj


if __name__ == "__main__":
    # Small synthetic config consistent with the module:
    #   n_embed=32, n_head=4 -> head_dim=8, seq T=8, batch B=2
    B, T, C, H = 2, 8, 32, 4
    hd = C // H

    key = jax.random.PRNGKey(0)
    kx, kq, kk, kv, kp, kb = jax.random.split(key, 6)

    x = jax.random.normal(kx, (B, T, C), dtype=jnp.float32)
    wq = jax.random.normal(kq, (H, C, hd), dtype=jnp.float32) * 0.1
    wk = jax.random.normal(kk, (H, C, hd), dtype=jnp.float32) * 0.1
    wv = jax.random.normal(kv, (H, C, hd), dtype=jnp.float32) * 0.1
    w_proj = jax.random.normal(kp, (C, C), dtype=jnp.float32) * 0.1
    b_proj = jax.random.normal(kb, (1, C), dtype=jnp.float32) * 0.1

    # Prepack the fused QKV weight once (outside the jitted forward).
    w_qkv = prepack_qkv_weights(wq, wk, wv)

    ref = multi_head_attention_ref(x, wq, wk, wv, w_proj, b_proj)

    # --- f32 path (exact softmax, f32 MXU inputs) ---
    out = multi_head_attention(x, w_qkv, w_proj, b_proj, n_head=H, use_bf16=False)
    out = jax.block_until_ready(out)
    assert out.shape == (B, T, C)
    assert jnp.allclose(out, ref, atol=2e-2, rtol=2e-2), (
        "f32 kernel mismatch vs reference; max abs err = "
        f"{float(jnp.max(jnp.abs(out - ref)))}")

    # --- bf16 MXU-input path (f32 accumulation / softmax); looser tolerance ---
    out_bf16 = multi_head_attention(x, w_qkv, w_proj, b_proj, n_head=H, use_bf16=True)
    out_bf16 = jax.block_until_ready(out_bf16)
    assert out_bf16.shape == (B, T, C)
    assert jnp.allclose(out_bf16, ref, atol=1e-1, rtol=1e-1), (
        "bf16 kernel mismatch vs reference; max abs err = "
        f"{float(jnp.max(jnp.abs(out_bf16 - ref)))}")

    print("KERNEL_OK")
</pallas_src>

<mosaic_0001>
module attributes {stable_mosaic.version = 11 : i64} {
  func.func @mha_fused_kernel(%arg0: i32, %arg1: memref<1x8x32xf32, #tpu.memory_space<vmem>>, %arg2: memref<32x96xf32, #tpu.memory_space<vmem>>, %arg3: memref<32x32xf32, #tpu.memory_space<vmem>>, %arg4: memref<1x32xf32, #tpu.memory_space<vmem>>, %arg5: memref<1x8x32xf32, #tpu.memory_space<vmem>>, %arg6: memref<8x32xf32, #tpu.memory_space<vmem>>) attributes {dimension_semantics = [#tpu.dimension_semantics<parallel>], iteration_bounds = array<i64: 2>, scalar_prefetch = 0 : i64, scratch_operands = 1 : i64, tpu.core_type = #tpu.core_type<tc>, window_params = [{transform_indices = @transform_0, window_bounds = array<i64: 1, 8, 32>}, {pipeline_mode = #tpu.pipeline_mode<synchronous>, transform_indices = @transform_1, window_bounds = array<i64: 32, 96>}, {pipeline_mode = #tpu.pipeline_mode<synchronous>, transform_indices = @transform_2, window_bounds = array<i64: 32, 32>}, {pipeline_mode = #tpu.pipeline_mode<synchronous>, transform_indices = @transform_3, window_bounds = array<i64: 1, 32>}, {transform_indices = @transform_4, window_bounds = array<i64: 1, 8, 32>}]} {
    %c0 = arith.constant 0 : index
    %c0_0 = arith.constant 0 : index
    %c0_1 = arith.constant 0 : index
    %0 = vector.load %arg1[%c0, %c0_0, %c0_1] : memref<1x8x32xf32, #tpu.memory_space<vmem>>, vector<1x8x32xf32>
    %1 = vector.shape_cast %0 : vector<1x8x32xf32> to vector<8x32xf32>
    %c0_2 = arith.constant 0 : index
    %c0_3 = arith.constant 0 : index
    %2 = vector.load %arg2[%c0_2, %c0_3] : memref<32x96xf32, #tpu.memory_space<vmem>>, vector<32x96xf32>
    %cst = arith.constant dense<0.000000e+00> : vector<8x96xf32>
    %3 = tpu.matmul %1, %2, %cst {dimension_numbers = #tpu.dot_dimension_numbers<[1], [0], [0], [1], [0, 0, 1, 1], [], []>} : vector<8x32xf32>, vector<32x96xf32>, vector<8x96xf32> -> vector<8x96xf32>
    %cst_4 = arith.constant 8.000000e+00 : f32
    %4 = math.sqrt %cst_4 : f32
    %cst_5 = arith.constant 1.000000e+00 : f32
    %5 = arith.divf %cst_5, %4 : f32
    %6 = tpu.iota {dimensions = array<i32: 0>} : vector<8x8xi32>
    %7 = tpu.iota {dimensions = array<i32: 1>} : vector<8x8xi32>
    %8 = arith.cmpi sle, %7, %6 : vector<8x8xi32>
    %9 = vector.extract_strided_slice %3 {offsets = [0, 0], sizes = [8, 8], strides = [1, 1]} : vector<8x96xf32> to vector<8x8xf32>
    %10 = vector.extract_strided_slice %3 {offsets = [0, 32], sizes = [8, 8], strides = [1, 1]} : vector<8x96xf32> to vector<8x8xf32>
    %11 = vector.extract_strided_slice %3 {offsets = [0, 64], sizes = [8, 8], strides = [1, 1]} : vector<8x96xf32> to vector<8x8xf32>
    %cst_6 = arith.constant dense<0.000000e+00> : vector<8x8xf32>
    %12 = tpu.matmul %9, %10, %cst_6 {dimension_numbers = #tpu.dot_dimension_numbers<[1], [1], [0], [0], [0, 0, 1, 0], [], []>} : vector<8x8xf32>, vector<8x8xf32>, vector<8x8xf32> -> vector<8x8xf32>
    %13 = vector.broadcast %5 : f32 to vector<8x8xf32>
    %14 = arith.mulf %12, %13 : vector<8x8xf32>
    %cst_7 = arith.constant -1.000000e+30 : f32
    %15 = vector.broadcast %cst_7 : f32 to vector<8x8xf32>
    %16 = arith.select %8, %14, %15 : vector<8x8xi1>, vector<8x8xf32>
    %cst_8 = arith.constant dense<0xFF800000> : vector<8xf32>
    %17 = vector.multi_reduction <maximumf>, %16, %cst_8 [1] : vector<8x8xf32> to vector<8xf32>
    %18 = vector.shape_cast %17 : vector<8xf32> to vector<8x1xf32>
    %19 = vector.broadcast %18 : vector<8x1xf32> to vector<8x8xf32>
    %20 = arith.subf %16, %19 : vector<8x8xf32>
    %21 = math.exp %20 : vector<8x8xf32>
    %cst_9 = arith.constant dense<0.000000e+00> : vector<8xf32>
    %22 = vector.multi_reduction <add>, %21, %cst_9 [1] : vector<8x8xf32> to vector<8xf32>
    %23 = vector.shape_cast %22 : vector<8xf32> to vector<8x1xf32>
    %24 = vector.broadcast %23 : vector<8x1xf32> to vector<8x8xf32>
    %25 = arith.divf %21, %24 : vector<8x8xf32>
    %cst_10 = arith.constant dense<0.000000e+00> : vector<8x8xf32>
    %26 = tpu.matmul %25, %11, %cst_10 {dimension_numbers = #tpu.dot_dimension_numbers<[1], [0], [0], [1], [0, 0, 1, 1], [], []>} : vector<8x8xf32>, vector<8x8xf32>, vector<8x8xf32> -> vector<8x8xf32>
    %c0_11 = arith.constant 0 : index
    %c0_12 = arith.constant 0 : index
    %27 = vector.load %arg6[%c0_11, %c0_12] : memref<8x32xf32, #tpu.memory_space<vmem>>, vector<8x8xf32>
    tpu.vector_store %arg6[%c0_11, %c0_12], %26 {strides = array<i32>} : memref<8x32xf32, #tpu.memory_space<vmem>>, vector<8x8xf32>,
    %28 = vector.extract_strided_slice %3 {offsets = [0, 8], sizes = [8, 8], strides = [1, 1]} : vector<8x96xf32> to vector<8x8xf32>
    %29 = vector.extract_strided_slice %3 {offsets = [0, 40], sizes = [8, 8], strides = [1, 1]} : vector<8x96xf32> to vector<8x8xf32>
    %30 = vector.extract_strided_slice %3 {offsets = [0, 72], sizes = [8, 8], strides = [1, 1]} : vector<8x96xf32> to vector<8x8xf32>
    %cst_13 = arith.constant dense<0.000000e+00> : vector<8x8xf32>
    %31 = tpu.matmul %28, %29, %cst_13 {dimension_numbers = #tpu.dot_dimension_numbers<[1], [1], [0], [0], [0, 0, 1, 0], [], []>} : vector<8x8xf32>, vector<8x8xf32>, vector<8x8xf32> -> vector<8x8xf32>
    %32 = vector.broadcast %5 : f32 to vector<8x8xf32>
    %33 = arith.mulf %31, %32 : vector<8x8xf32>
    %cst_14 = arith.constant -1.000000e+30 : f32
    %34 = vector.broadcast %cst_14 : f32 to vector<8x8xf32>
    %35 = arith.select %8, %33, %34 : vector<8x8xi1>, vector<8x8xf32>
    %cst_15 = arith.constant dense<0xFF800000> : vector<8xf32>
    %36 = vector.multi_reduction <maximumf>, %35, %cst_15 [1] : vector<8x8xf32> to vector<8xf32>
    %37 = vector.shape_cast %36 : vector<8xf32> to vector<8x1xf32>
    %38 = vector.broadcast %37 : vector<8x1xf32> to vector<8x8xf32>
    %39 = arith.subf %35, %38 : vector<8x8xf32>
    %40 = math.exp %39 : vector<8x8xf32>
    %cst_16 = arith.constant dense<0.000000e+00> : vector<8xf32>
    %41 = vector.multi_reduction <add>, %40, %cst_16 [1] : vector<8x8xf32> to vector<8xf32>
    %42 = vector.shape_cast %41 : vector<8xf32> to vector<8x1xf32>
    %43 = vector.broadcast %42 : vector<8x1xf32> to vector<8x8xf32>
    %44 = arith.divf %40, %43 : vector<8x8xf32>
    %cst_17 = arith.constant dense<0.000000e+00> : vector<8x8xf32>
    %45 = tpu.matmul %44, %30, %cst_17 {dimension_numbers = #tpu.dot_dimension_numbers<[1], [0], [0], [1], [0, 0, 1, 1], [], []>} : vector<8x8xf32>, vector<8x8xf32>, vector<8x8xf32> -> vector<8x8xf32>
    %c0_18 = arith.constant 0 : index
    %c8 = arith.constant 8 : index
    %46 = vector.load %arg6[%c0_18, %c8] : memref<8x32xf32, #tpu.memory_space<vmem>>, vector<8x8xf32>
    tpu.vector_store %arg6[%c0_18, %c8], %45 {strides = array<i32>} : memref<8x32xf32, #tpu.memory_space<vmem>>, vector<8x8xf32>,
    %47 = vector.extract_strided_slice %3 {offsets = [0, 16], sizes = [8, 8], strides = [1, 1]} : vector<8x96xf32> to vector<8x8xf32>
    %48 = vector.extract_strided_slice %3 {offsets = [0, 48], sizes = [8, 8], strides = [1, 1]} : vector<8x96xf32> to vector<8x8xf32>
    %49 = vector.extract_strided_slice %3 {offsets = [0, 80], sizes = [8, 8], strides = [1, 1]} : vector<8x96xf32> to vector<8x8xf32>
    %cst_19 = arith.constant dense<0.000000e+00> : vector<8x8xf32>
    %50 = tpu.matmul %47, %48, %cst_19 {dimension_numbers = #tpu.dot_dimension_numbers<[1], [1], [0], [0], [0, 0, 1, 0], [], []>} : vector<8x8xf32>, vector<8x8xf32>, vector<8x8xf32> -> vector<8x8xf32>
    %51 = vector.broadcast %5 : f32 to vector<8x8xf32>
    %52 = arith.mulf %50, %51 : vector<8x8xf32>
    %cst_20 = arith.constant -1.000000e+30 : f32
    %53 = vector.broadcast %cst_20 : f32 to vector<8x8xf32>
    %54 = arith.select %8, %52, %53 : vector<8x8xi1>, vector<8x8xf32>
    %cst_21 = arith.constant dense<0xFF800000> : vector<8xf32>
    %55 = vector.multi_reduction <maximumf>, %54, %cst_21 [1] : vector<8x8xf32> to vector<8xf32>
    %56 = vector.shape_cast %55 : vector<8xf32> to vector<8x1xf32>
    %57 = vector.broadcast %56 : vector<8x1xf32> to vector<8x8xf32>
    %58 = arith.subf %54, %57 : vector<8x8xf32>
    %59 = math.exp %58 : vector<8x8xf32>
    %cst_22 = arith.constant dense<0.000000e+00> : vector<8xf32>
    %60 = vector.multi_reduction <add>, %59, %cst_22 [1] : vector<8x8xf32> to vector<8xf32>
    %61 = vector.shape_cast %60 : vector<8xf32> to vector<8x1xf32>
    %62 = vector.broadcast %61 : vector<8x1xf32> to vector<8x8xf32>
    %63 = arith.divf %59, %62 : vector<8x8xf32>
    %cst_23 = arith.constant dense<0.000000e+00> : vector<8x8xf32>
    %64 = tpu.matmul %63, %49, %cst_23 {dimension_numbers = #tpu.dot_dimension_numbers<[1], [0], [0], [1], [0, 0, 1, 1], [], []>} : vector<8x8xf32>, vector<8x8xf32>, vector<8x8xf32> -> vector<8x8xf32>
    %c0_24 = arith.constant 0 : index
    %c16 = arith.constant 16 : index
    %65 = vector.load %arg6[%c0_24, %c16] : memref<8x32xf32, #tpu.memory_space<vmem>>, vector<8x8xf32>
    tpu.vector_store %arg6[%c0_24, %c16], %64 {strides = array<i32>} : memref<8x32xf32, #tpu.memory_space<vmem>>, vector<8x8xf32>,
    %66 = vector.extract_strided_slice %3 {offsets = [0, 24], sizes = [8, 8], strides = [1, 1]} : vector<8x96xf32> to vector<8x8xf32>
    %67 = vector.extract_strided_slice %3 {offsets = [0, 56], sizes = [8, 8], strides = [1, 1]} : vector<8x96xf32> to vector<8x8xf32>
    %68 = vector.extract_strided_slice %3 {offsets = [0, 88], sizes = [8, 8], strides = [1, 1]} : vector<8x96xf32> to vector<8x8xf32>
    %cst_25 = arith.constant dense<0.000000e+00> : vector<8x8xf32>
    %69 = tpu.matmul %66, %67, %cst_25 {dimension_numbers = #tpu.dot_dimension_numbers<[1], [1], [0], [0], [0, 0, 1, 0], [], []>} : vector<8x8xf32>, vector<8x8xf32>, vector<8x8xf32> -> vector<8x8xf32>
    %70 = vector.broadcast %5 : f32 to vector<8x8xf32>
    %71 = arith.mulf %69, %70 : vector<8x8xf32>
    %cst_26 = arith.constant -1.000000e+30 : f32
    %72 = vector.broadcast %cst_26 : f32 to vector<8x8xf32>
    %73 = arith.select %8, %71, %72 : vector<8x8xi1>, vector<8x8xf32>
    %cst_27 = arith.constant dense<0xFF800000> : vector<8xf32>
    %74 = vector.multi_reduction <maximumf>, %73, %cst_27 [1] : vector<8x8xf32> to vector<8xf32>
    %75 = vector.shape_cast %74 : vector<8xf32> to vector<8x1xf32>
    %76 = vector.broadcast %75 : vector<8x1xf32> to vector<8x8xf32>
    %77 = arith.subf %73, %76 : vector<8x8xf32>
    %78 = math.exp %77 : vector<8x8xf32>
    %cst_28 = arith.constant dense<0.000000e+00> : vector<8xf32>
    %79 = vector.multi_reduction <add>, %78, %cst_28 [1] : vector<8x8xf32> to vector<8xf32>
    %80 = vector.shape_cast %79 : vector<8xf32> to vector<8x1xf32>
    %81 = vector.broadcast %80 : vector<8x1xf32> to vector<8x8xf32>
    %82 = arith.divf %78, %81 : vector<8x8xf32>
    %cst_29 = arith.constant dense<0.000000e+00> : vector<8x8xf32>
    %83 = tpu.matmul %82, %68, %cst_29 {dimension_numbers = #tpu.dot_dimension_numbers<[1], [0], [0], [1], [0, 0, 1, 1], [], []>} : vector<8x8xf32>, vector<8x8xf32>, vector<8x8xf32> -> vector<8x8xf32>
    %c0_30 = arith.constant 0 : index
    %c24 = arith.constant 24 : index
    %84 = vector.load %arg6[%c0_30, %c24] : memref<8x32xf32, #tpu.memory_space<vmem>>, vector<8x8xf32>
    tpu.vector_store %arg6[%c0_30, %c24], %83 {strides = array<i32>} : memref<8x32xf32, #tpu.memory_space<vmem>>, vector<8x8xf32>,
    %c0_31 = arith.constant 0 : index
    %c0_32 = arith.constant 0 : index
    %85 = vector.load %arg6[%c0_31, %c0_32] : memref<8x32xf32, #tpu.memory_space<vmem>>, vector<8x32xf32>
    %c0_33 = arith.constant 0 : index
    %c0_34 = arith.constant 0 : index
    %86 = vector.load %arg3[%c0_33, %c0_34] : memref<32x32xf32, #tpu.memory_space<vmem>>, vector<32x32xf32>
    %cst_35 = arith.constant dense<0.000000e+00> : vector<8x32xf32>
    %87 = tpu.matmul %85, %86, %cst_35 {dimension_numbers = #tpu.dot_dimension_numbers<[1], [0], [0], [1], [0, 0, 1, 1], [], []>} : vector<8x32xf32>, vector<32x32xf32>, vector<8x32xf32> -> vector<8x32xf32>
    %c0_36 = arith.constant 0 : index
    %c0_37 = arith.constant 0 : index
    %88 = vector.load %arg4[%c0_36, %c0_37] : memref<1x32xf32, #tpu.memory_space<vmem>>, vector<1x32xf32>
    %89 = vector.broadcast %88 : vector<1x32xf32> to vector<8x32xf32>
    %90 = arith.addf %87, %89 : vector<8x32xf32>
    %c0_38 = arith.constant 0 : index
    %c0_39 = arith.constant 0 : index
    %c0_40 = arith.constant 0 : index
    %91 = vector.load %arg5[%c0_38, %c0_39, %c0_40] : memref<1x8x32xf32, #tpu.memory_space<vmem>>, vector<1x8x32xf32>
    %92 = vector.shape_cast %91 : vector<1x8x32xf32> to vector<8x32xf32>
    %93 = vector.shape_cast %90 : vector<8x32xf32> to vector<1x8x32xf32>
    tpu.vector_store %arg5[%c0_38, %c0_39, %c0_40], %93 {strides = array<i32>} : memref<1x8x32xf32, #tpu.memory_space<vmem>>, vector<1x8x32xf32>,
    return
  }
  func.func @transform_0(%arg0: i32) -> (i32, i32, i32) {
    %c0_i32 = arith.constant 0 : i32
    %c0_i32_0 = arith.constant 0 : i32
    %c0_i32_1 = arith.constant 0 : i32
    return %arg0, %c0_i32, %c0_i32_0 : i32, i32, i32
  }
  func.func @transform_1(%arg0: i32) -> (i32, i32) {
    %c0_i32 = arith.constant 0 : i32
    %c0_i32_0 = arith.constant 0 : i32
    %c0_i32_1 = arith.constant 0 : i32
    return %c0_i32, %c0_i32_0 : i32, i32
  }
  func.func @transform_2(%arg0: i32) -> (i32, i32) {
    %c0_i32 = arith.constant 0 : i32
    %c0_i32_0 = arith.constant 0 : i32
    %c0_i32_1 = arith.constant 0 : i32
    return %c0_i32, %c0_i32_0 : i32, i32
  }
  func.func @transform_3(%arg0: i32) -> (i32, i32) {
    %c0_i32 = arith.constant 0 : i32
    %c0_i32_0 = arith.constant 0 : i32
    %c0_i32_1 = arith.constant 0 : i32
    return %c0_i32, %c0_i32_0 : i32, i32
  }
  func.func @transform_4(%arg0: i32) -> (i32, i32, i32) {
    %c0_i32 = arith.constant 0 : i32
    %c0_i32_0 = arith.constant 0 : i32
    %c0_i32_1 = arith.constant 0 : i32
    return %arg0, %c0_i32, %c0_i32_0 : i32, i32, i32
  }
}

</mosaic_0001>

<bundles_post_ra>
// kernel: multi_head_attention.1
= control target key start
LH: loop header
LB: loop body
LE: loop exit
PB: predicated region body
PF: predicated region fallthrough
CT: control target
= control target key end

     0   :  { %9 = vsyncpa [#allocation4], 0  ;;  %s1307_s0 = inlined_call_operand.hbm [shape: f32[2,8,32], index: 0, kind: input, shape index: {}]   ;;  %s1308_s1 = inlined_call_operand.hbm [shape: f32[32,96], index: 1, kind: input, shape index: {}]   ;;  %s1309_s2 = inlined_call_operand.hbm [shape: f32[32,32], index: 2, kind: input, shape index: {}]   ;;  %s1310_s3 = inlined_call_operand.vmem [shape: f32[1,32], index: 3, kind: input, shape index: {}]   ;;  %s1311_s4 = inlined_call_operand.hbm [shape: f32[2,8,32], index: 4, kind: output, shape index: {}]  }
   0x1   :  { %11 = vsyncpa [#allocation4 + $0x1], 0 }
   0x2   :  { %12 = vsyncpa [#allocation7], 0 }
   0x3   :  { %13 = vsyncpa [#allocation5], 0 }
   0x4   :  { %15 = vsyncpa [#allocation5 + $0x1], 0  ;;  %s1094_s15 = smov 0   ;;  %s1096_s16 = smov 0  }
   0x5   :  { %s1098_s17 = smov 0   ;;  %s1100_s18 = smov 0  }
   0x6 LB: > { %s152_s21 = sshll.u32 %s1308_s1, 4  ;;  %s1118_s22 = sadd.s32 4294967295, %s1049_s18   ;;  %s1049_s18 = sphi %s1100_s18, %s1322_s18   ;;  %s1045_s17 = sphi %s1098_s17, %s1321_s17   ;;  %s1041_s16 = sphi %s1096_s16, %s1320_s16   ;;  %s1037_s15 = sphi %s1094_s15, %s1319_s15   ;;  %s153_s21 = int_to_ptr.hbm [resolvable:$true] %s152_s21 }
   0x7   : > { %p760_p0 = scmp.ge.s32.totalorder %s1049_s18, 1  ;;  %p42_p1 = scmp.eq.s32.totalorder %s1118_s22, 0 }
   0x8   : > { %p141_p2 = scmp.lt.s32.totalorder %s1049_s18, 3  ;;  %s1051_s24 = smov [#allocation6]  }
   0x9   : > { %s154_s25 = sshll.u32 %s1051_s24, 4  ;;  %s166_s28 = sshll.u32 %s1309_s2, 4  ;;  %s155_s25 = int_to_ptr.vmem [resolvable:$true] %s154_s25  ;;  %s167_s28 = int_to_ptr.hbm [resolvable:$true] %s166_s28 }
   0xa   : > { %p1123_p3 = pnand %p760_p0, %p141_p2  ;;  %s1052_s29 = smov [#allocation8]  }
   0xb   : > { %s168_s30 = sshll.u32 %s1052_s29, 4  ;;  %s1053_s5 = smov 128   ;;  %s169_s30 = int_to_ptr.vmem [resolvable:$true] %s168_s30 }
   0xc   : > { %p801_p4 = pneg %p1123_p3  ;;  %s1054_s6 = smov 8  }
   0xd   : > { %s759_s7 = sadd.s32 4294967294, %s1049_s18   ;;  %s1137_s8 = sadd.s32 1, %s1049_s18  }
   0xe   : > { %p802_p6 = pnand %p801_p4, %p42_p1  ;;  %s25_s9 = ssub.s32 %s1049_s18, %s1137_s8 }
   0xf   : > { %s28_s10 = sadd.s32 1, %s1045_s17  ;;  %p26_p7 = scmp.eq.s32.totalorder %s25_s9, 0 }
  0x10   : > { %804 = dma.hbm_to_vmem [thread:$0]  (!%p802_p6), %s153_s21, 512, %s155_s25, [#allocation7], %s1053_s5, %s1053_s5, %s1054_s6  }
  0x11   : > { %807 = dma.hbm_to_vmem [thread:$0]  (!%p802_p6), %s167_s28, 512, %s169_s30, [#allocation7], %s1053_s5, %s1053_s5, %s1054_s6  }
  0x12   : > { %p35_p8 = scmp.ne.s32.totalorder %s1045_s17, %s1041_s16  ;;  %p36_p9 = scmp.eq.s32.totalorder %s1049_s18, 0 }
  0x13   : > { %p41_p10 = scmp.ne.s32.totalorder %s1041_s16, %s1037_s15  ;;  %p128_p13 = scmp.eq.s32.totalorder %s1118_s22, 1 }
  0x14   : > { %s1148_s11 = scalar_select %p26_p7, %s1045_s17, %s28_s10  }
  0x15   : > { %p1150_p11 = por %p36_p9, %p35_p8  ;;  %p1156_p12 = por %p42_p1, %p41_p10 }
  0x16   : > { %p134_p0 = scmp.eq.s32.totalorder %s759_s7, 1  ;;  %p818_p2 = scmp.lt.s32.totalorder %s1049_s18, 2 }
  0x17   : > { %s185_s14 = sand.u32 1, %s1045_s17   ;;  %p1163_p4 = por %p128_p13, %p35_p8 }
  0x18   : > { %p1167_p6 = por %p134_p0, %p41_p10  ;;  %s764_s21 = sshll.u32 %s185_s14, 3 }
  0x19   : > { %s765_s24 = sshll.u32 %s1049_s18, 3  ;;  %s189_s28 = scalar_lea.vmem [#allocation3], %s764_s21 }
  0x1a   : > { %s193_s27 = scalar_lea.hbm %s1307_s0, %s765_s24  ;;  %s197_s29 = sshll.u32 %s189_s28, 4  ;;  %s198_s29 = int_to_ptr.vmem [resolvable:$true] %s197_s29 }
  0x1b   : > { %s195_s30 = sshll.u32 %s193_s27, 4  ;;  %p1177_p7 = pnand %p818_p2, %p1150_p11  ;;  %s196_s30 = int_to_ptr.hbm [resolvable:$true] %s195_s30 }
  0x1c   : > { %s186_s6 = scalar_lea.sflag [#allocation4], %s185_s14  ;;  %s949_s7 = sshra.s32 %s196_s30, 4  ;;  %s950_s7 = int_to_ptr.hbm [resolvable:$true] %s949_s7 }
  0x1d   : > { %s951_s9 = scalar_lea.hbm %s950_s7, 8  ;;  %p953_p9 = pneg %p1177_p7 }
  0x1e   : > { %p952_p8 = scmp.ne.s32.totalorder %s950_s7, %s951_s9  ;;  %s956_s24 = scalar_lea.hbm %s1307_s0, 16 }
  0x1f   : > { %p957_p11 = scmp.lt.s32.totalorder %s950_s7, %s1307_s0  ;;  %p958_p0 = scmp.lt.s32.totalorder %s956_s24, %s951_s9 }
  0x20   : > { %p954_p10 = pnand %p953_p9, %p952_p8 }
  0x21   : > { %p959_p2 = por %p958_p0, %p957_p11 }
  0x22   : > { %p955_p13 = pneg %p954_p10 }
  0x24   : > { %p960_p5 = pnand %p959_p2, %p955_p13 }
  0x26   : > { %963 = shalt.err (!%p960_p5)
}
  0x27   : > { %811 = dma.hbm_to_vmem [thread:$0]  (!%p1177_p7), %s196_s30, 128, %s198_s29, %s186_s6  }
  0x28   : > { %206 = sbr.rel (%p1123_p3) target bundleno = 1109 (0x455), region = 36  ;;  %s1194_s14 = sand.u32 (!%p1123_p3), 1, %s1041_s16  }
  0x29   : > { %s767_s26 = sshll.u32 (!%p1123_p3), %s1194_s14, 3  ;;  %s209_s27 = scalar_lea.sflag (!%p1123_p3), [#allocation4], %s1194_s14 }
  0x2a   : > { %s212_s28 = scalar_lea.vmem (!%p1123_p3), [#allocation3], %s767_s26 }
  0x2d   : > { %1024 = dma.done.wait (%p1156_p12), %s209_s27, 128  }
  0x2e   : > { %1026 = vsyncadd (%p1156_p12), %s209_s27, 4294967168 }
  0x2f   : > { %1028 = dma.done.wait (%p42_p1), [#allocation7], 1024  }
  0x30   : > { %1030 = vsyncadd (%p42_p1), [#allocation7], 4294966272  ;;  %v252_v0 = vld [vmem:[#allocation6 + $0x18] sm:$0xff]  ;;  %v251_v1 = vld [vmem:[#allocation6 + $0x10] sm:$0xff]  ;;  %vm253_vm0 = vcmask 261120   ;;  %s1055_s23 = smov 72   ;;  %v277_v13 = vlaneseq }
  0x31   : > { %269 = vmatpush.msra.mxu0 %v252_v0  ;;  %v250_v2 = vld [vmem:[#allocation6 + $0x8] sm:$0xff]  ;;  %v249_v3 = vld [vmem:[#allocation6] sm:$0xff]  ;;  %v248_v4 = vld [vmem:[%s212_s28] sm:$0xff]  ;;  %s1056_s13 = smov 120   ;;  %s1057_s29 = smov 96   ;;  %vm285_vm1 = vcmask 64512  }
  0x32   : > { %s1058_s30 = smov 112   ;;  %s1059_s5 = smov 80   ;;  %v278_v14 = vshrl.u32 %v277_v13, 7  ;;  %v280_v15 = vand.u32 127, %v277_v13 }
  0x33   : > { %270 = vmatpush.msra.mxu0 %v251_v1  ;;  %s1060_s6 = smov 88   ;;  %s1061_s7 = smov 104  }
  0x34   : > { %vm281_vm2 = vcmp.le.s32.totalorder %v280_v15, %v278_v14  ;;  %s1062_s9 = smov 56   ;;  %s1063_s10 = smov 40  }
  0x35   : > { %271 = vmatpush.msra.mxu0 %v250_v2  ;;  %s1064_s21 = smov 64   ;;  %s1065_s24 = smov 48  }
  0x36   : > { %s1066_s25 = smov 8   ;;  %s1067_s12 = smov 24  }
  0x37   : > { %272 = vmatpush.msra.mxu0 %v249_v3  ;;  %s1068_s27 = smov 16   ;;  %s786_s28 = sshll.u32 %s1118_s22, 3 }
  0x38   : > { %771 = vmatmul.msk.f32.vlgmr.msra.gmra.mxu0 %vm253_vm0, %v248_v4  ;;  %s655_s22 = scalar_lea.sflag [#allocation5], %s1194_s14 }
  0xb5   : > { %v1209_v5 = vpop.f32.mrf.mxu0 }
  0xb6   : > { %537 = vrot.lane.b32.xlu2 %v1209_v5, %s1055_s23  ;;  %363 = vrot.lane.b32.xlu1 %v1209_v5, %s1056_s13 }
  0xb7   : > { %283 = vrot.lane.b32.xlu0 %v1209_v5, %s1057_s29  ;;  %s665_s29 = scalar_lea.hbm %s1311_s4, %s786_s28 }
  0xbe   : > { %449 = vrot.lane.b32.xlu2 %v1209_v5, %s1058_s30  ;;  %451 = vrot.lane.b32.xlu1 %v1209_v5, %s1059_s5 }
  0xbf   : > { %365 = vrot.lane.b32.xlu0 %v1209_v5, %s1060_s6  ;;  %s247_s6 = scalar_lea.vmem [#allocation9], %s767_s26  ;;  %s999_s26 = scalar_lea.hbm %s1311_s4, 16 }
  0xc7   : > { %535 = vrot.lane.b32.xlu0 %v1209_v5, %s1061_s7  ;;  %s667_s7 = sshll.u32 %s247_s6, 4  ;;  %s668_s7 = int_to_ptr.vmem [resolvable:$true] %s667_s7 }
 0x110   : > { %v538_v6 = vpop.permute.xlu2 %537 }
 0x111   : > { %781 = vmatpush.xpose.msk.msrb.mxu0 %vm285_vm1, %v538_v6 }
 0x118   : > { %v450_v11 = vpop.permute.xlu2 %449 }
 0x128   : > { %v364_v7 = vpop.permute.xlu1 %363 }
 0x129   : > { %v284_v8 = vpop.permute.xlu0 %283 }
 0x12a   : > { %772 = vmatpush.xpose.msk.msra.mxu1 %vm285_vm1, %v284_v8 }
 0x12d   : > { %773 = vmatmul.msk.f32.vlgmr.msra.gmra.mxu1 %vm285_vm1, %v1209_v5 }
 0x130   : > { %v452_v9 = vpop.permute.xlu1 %451 }
 0x131   : > { %v366_v10 = vpop.permute.xlu0 %365  ;;  %778 = vmatpush.xpose.msk.msrb.mxu1 %vm285_vm1, %v452_v9 }
 0x132   : > { %775 = vmatpush.xpose.msk.msra.mxu3 %vm285_vm1, %v366_v10 }
 0x135   : > { %776 = vmatmul.msk.f32.vlgmr.msra.gmra.mxu3 %vm285_vm1, %v364_v7  ;;  %779 = vmatmul.msk.f32.vlgmr.msrb.gmra.mxu1 %vm285_vm1, %v450_v11 }
 0x139   : > { %v536_v12 = vpop.permute.xlu0 %535 }
 0x13a   : > { %782 = vmatmul.msk.f32.vlgmr.msrb.gmra.mxu0 %vm285_vm1, %v536_v12 }
 0x1aa   : > { %v307_v16 = vpop.f32.mrf.mxu1 }
 0x1ab   : > { %v310_v17 = vmul.f32 0.35355338, %v307_v16 }
 0x1ad   : > { %v311_v18 = vsel %vm281_vm2, %v310_v17, -1e+30 }
 0x1ae   : > { %v312_v19 = vsel %vm285_vm1, %v311_v18, -inf }
 0x1af   : > { %313 = vmax.xlane.f32.xlu1 %v312_v19 }
 0x1b2   : > { %v474_v20 = vpop.f32.mrf.mxu1 }
 0x1b3   : > { %v477_v21 = vmul.f32 0.35355338, %v474_v20 }
 0x1b5   : > { %v478_v22 = vsel %vm281_vm2, %v477_v21, -1e+30 }
 0x1b6   : > { %v479_v23 = vsel %vm285_vm1, %v478_v22, -inf }
 0x1b7   : > { %480 = vmax.xlane.f32.xlu0 %v479_v23  ;;  %v560_v26 = vpop.f32.mrf.mxu0 }
 0x1b8   : > { %v388_v24 = vpop.f32.mrf.mxu3  ;;  %v563_v29 = vmul.f32 0.35355338, %v560_v26 }
 0x1b9   : > { %v391_v25 = vmul.f32 0.35355338, %v388_v24 }
 0x1ba   : > { %v564_v30 = vsel %vm281_vm2, %v563_v29, -1e+30 }
 0x1bb   : > { %v392_v27 = vsel %vm281_vm2, %v391_v25, -1e+30  ;;  %v565_v31 = vsel %vm285_vm1, %v564_v30, -inf }
 0x1bc   : > { %v393_v28 = vsel %vm285_vm1, %v392_v27, -inf }
 0x1bd   : > { %394 = vmax.xlane.f32.xlu2 %v393_v28 }
 0x1c5   : > { %566 = vmax.xlane.f32.xlu2 %v565_v31 }
 0x1cb   : > { %417 = vrot.lane.b32.xlu0 %v1209_v5, %s1062_s9  ;;  %s669_s9 = sshll.u32 %s665_s29, 4  ;;  %s670_s9 = int_to_ptr.hbm [resolvable:$true] %s669_s9 }
 0x222   : > { %v314_v32 = vpop.xlane.xlu1 %313 }
 0x223   : > { %v315_v33 = vsub.f32 %v311_v18, %v314_v32 }
 0x225   : > { %v316_v34 = vmul.f32 1.442695, %v315_v33 }
 0x227   : > { %873 = vpow2.f32 %v316_v34 }
 0x22a   : > { %v481_v35 = vpop.xlane.xlu0 %480 }
 0x22b   : > { %v482_v36 = vsub.f32 %v478_v22, %v481_v35 }
 0x22d   : > { %v874_v37 = vpop.eup %873  ;;  %v483_v38 = vmul.f32 1.442695, %v482_v36 }
 0x22e   : > { %v318_v39 = vsel %vm285_vm1, %v874_v37, 0.0 }
 0x22f   : > { %875 = vpow2.f32 %v483_v38  ;;  %319 = vadd.xlane.f32.xlu1 %v318_v39 }
 0x230   : > { %v395_v40 = vpop.xlane.xlu2 %394 }
 0x231   : > { %v396_v41 = vsub.f32 %v392_v27, %v395_v40 }
 0x233   : > { %v397_v42 = vmul.f32 1.442695, %v396_v41 }
 0x235   : > { %v1237_v43 = vpop.eup %875  ;;  %877 = vpow2.f32 %v397_v42 }
 0x236   : > { %v485_v44 = vsel %vm285_vm1, %v1237_v43, 0.0 }
 0x237   : > { %486 = vadd.xlane.f32.xlu0 %v485_v44 }
 0x238   : > { %v567_v45 = vpop.xlane.xlu2 %566 }
 0x239   : > { %v568_v46 = vsub.f32 %v564_v30, %v567_v45 }
 0x23b   : > { %v1241_v47 = vpop.eup %877  ;;  %v569_v48 = vmul.f32 1.442695, %v568_v46  ;;  %v625_v46 = vld [vmem:[#allocation8 + $0x18] sm:$0xff] }
 0x23c   : > { %v399_v49 = vsel %vm285_vm1, %v1241_v47, 0.0  ;;  %645 = vmatpush.msra.mxu1 %v625_v46 }
 0x23d   : > { %879 = vpow2.f32 %v569_v48  ;;  %400 = vadd.xlane.f32.xlu2 %v399_v49  ;;  %v418_v53 = vpop.permute.xlu0 %417  ;;  %v622_v48 = vld [vmem:[#allocation8] sm:$0xff] }
 0x243   : > { %v1245_v50 = vpop.eup %879 }
 0x244   : > { %v571_v51 = vsel %vm285_vm1, %v1245_v50, 0.0 }
 0x245   : > { %572 = vadd.xlane.f32.xlu1 %v571_v51 }
 0x24b   : > { %589 = vrot.lane.b32.xlu0 %v1209_v5, %s1063_s10  ;;  %s993_s10 = sshra.s32 %s670_s9, 4  ;;  %s994_s10 = int_to_ptr.hbm [resolvable:$true] %s993_s10 }
 0x24c   : > { %p1000_p12 = scmp.lt.s32.totalorder %s994_s10, %s1311_s4 }
 0x255   : > { %336 = vrot.lane.b32.xlu2 %v1209_v5, %s1064_s21  ;;  %s995_s21 = scalar_lea.hbm %s994_s10, 8 }
 0x256   : > { %p996_p1 = scmp.ne.s32.totalorder %s994_s10, %s995_s21  ;;  %p1001_p7 = scmp.lt.s32.totalorder %s999_s26, %s995_s21 }
 0x258   : > { %p997_p3 = pnand %p996_p1, %p1163_p4  ;;  %p1002_p8 = por %p1001_p7, %p1000_p12 }
 0x25a   : > { %p998_p5 = pneg %p997_p3 }
 0x25c   : > { %p1003_p9 = pnand %p1002_p8, %p998_p5 }
 0x25e   : > { %503 = vrot.lane.b32.xlu1 %v1209_v5, %s1065_s24 }
 0x2a2   : > { %v320_v52 = vpop.xlane.xlu1 %319 }
 0x2a3   : > { %881 = vrcp.f32 %v320_v52  ;;  %v332_v59 = vand.u32 2147483648, %v320_v52  ;;  %vm326_vm4 = vweird.f32 %v320_v52  ;;  %v330_v62 = vand.u32 2147483647, %v320_v52 }
 0x2a5   : > { %v333_v0 = vor.u32 1.1754944e-38, %v332_v59  ;;  %vm331_vm6 = vcmp.eq.f32.partialorder %v330_v62, 8.507059e+37 }
 0x2a9   : > { %v882_v54 = vpop.eup %881 }
 0x2aa   : > { %v322_v55 = vmul.f32 %v882_v54, %v320_v52  ;;  %v1252_v57 = vpop.xlane.xlu0 %486  ;;  %vm327_vm3 = vweird.f32 %v882_v54  ;;  %v872_v52 = vld [vmem:[%s1310_s3] ss:$0 sm:$0xff] }
 0x2ab   : > { %883 = vrcp.f32 %v1252_v57  ;;  %vm328_vm5 = vmor %vm326_vm4, %vm327_vm3  ;;  %v499_v29 = vand.u32 2147483648, %v1252_v57  ;;  %vm493_vm15 = vweird.f32 %v1252_v57  ;;  %v497_v31 = vand.u32 2147483647, %v1252_v57 }
 0x2ac   : > { %v323_v56 = vsub.f32 1.0, %v322_v55 }
 0x2ad   : > { %v500_v36 = vor.u32 1.1754944e-38, %v499_v29  ;;  %vm498_vm4 = vcmp.eq.f32.partialorder %v497_v31, 8.507059e+37 }
 0x2ae   : > { %v324_v58 = vmul.f32 %v882_v54, %v323_v56 }
 0x2b0   : > { %v401_v60 = vpop.xlane.xlu2 %400  ;;  %v325_v61 = vadd.f32 %v882_v54, %v324_v58 }
 0x2b1   : > { %885 = vrcp.f32 %v401_v60  ;;  %v884_v2 = vpop.eup %883  ;;  %v413_v10 = vand.u32 2147483648, %v401_v60  ;;  %v411_v12 = vand.u32 2147483647, %v401_v60  ;;  %vm407_vm8 = vweird.f32 %v401_v60 }
 0x2b2   : > { %v329_v63 = vsel %vm328_vm5, %v882_v54, %v325_v61  ;;  %v489_v8 = vmul.f32 %v884_v2, %v1252_v57  ;;  %vm494_vm12 = vweird.f32 %v884_v2  ;;  %vm447_vm5 = vcmask 130112  }
 0x2b3   : > { %v334_v1 = vsel %vm331_vm6, %v333_v0, %v329_v63  ;;  %v414_v17 = vor.u32 1.1754944e-38, %v413_v10  ;;  %vm412_vm10 = vcmp.eq.f32.partialorder %v411_v12, 8.507059e+37  ;;  %vm495_vm3 = vmor %vm493_vm15, %vm494_vm12  ;;  %vm619_vm6 = vcmask 261312  }
 0x2b4   : > { %v335_v7 = vmul.f32 %v874_v37, %v334_v1  ;;  %v490_v14 = vsub.f32 1.0, %v489_v8 }
 0x2b6   : > { %v491_v21 = vmul.f32 %v884_v2, %v490_v14 }
 0x2b7   : > { %v886_v3 = vpop.eup %885 }
 0x2b8   : > { %v403_v4 = vmul.f32 %v886_v3, %v401_v60  ;;  %v573_v5 = vpop.xlane.xlu1 %572  ;;  %v337_v6 = vpop.permute.xlu2 %336  ;;  %vm408_vm7 = vweird.f32 %v886_v3  ;;  %v492_v27 = vadd.f32 %v884_v2, %v491_v21 }
 0x2b9   : > { %887 = vrcp.f32 %v573_v5  ;;  %357 = vmatpush.msra.mxu2 %v337_v6  ;;  %vm409_vm9 = vmor %vm407_vm8, %vm408_vm7  ;;  %v585_v24 = vand.u32 2147483648, %v573_v5  ;;  %v583_v26 = vand.u32 2147483647, %v573_v5  ;;  %vm579_vm13 = vweird.f32 %v573_v5 }
 0x2ba   : > { %v404_v9 = vsub.f32 1.0, %v403_v4  ;;  %774 = vmatmul.msk.f32.vlgmr.msra.gmra.mxu2 %vm285_vm1, %v335_v7  ;;  %v496_v35 = vsel %vm495_vm3, %v884_v2, %v492_v27 }
 0x2bb   : > { %438 = vmatpush.msrb.mxu2 %v418_v53  ;;  %v586_v30 = vor.u32 1.1754944e-38, %v585_v24  ;;  %vm584_vm2 = vcmp.eq.f32.partialorder %v583_v26, 8.507059e+37  ;;  %v501_v37 = vsel %vm498_vm4, %v500_v36, %v496_v35 }
 0x2bc   : > { %v405_v11 = vmul.f32 %v886_v3, %v404_v9  ;;  %v502_v39 = vmul.f32 %v1237_v43, %v501_v37  ;;  %v624_v43 = vld [vmem:[#allocation8 + $0x10] sm:$0xff] }
 0x2bd   : > { %v590_v13 = vpop.permute.xlu0 %589  ;;  %646 = vmatpush.msra.mxu1 %v624_v43 }
 0x2be   : > { %v406_v15 = vadd.f32 %v886_v3, %v405_v11  ;;  %610 = vmatpush.msra.mxu2 %v590_v13 }
 0x2bf   : > { %v888_v16 = vpop.eup %887 }
 0x2c0   : > { %v575_v18 = vmul.f32 %v888_v16, %v573_v5  ;;  %v410_v19 = vsel %vm409_vm9, %v886_v3, %v406_v15  ;;  %vm580_vm11 = vweird.f32 %v888_v16 }
 0x2c1   : > { %v415_v20 = vsel %vm412_vm10, %v414_v17, %v410_v19  ;;  %vm581_vm14 = vmor %vm579_vm13, %vm580_vm11 }
 0x2c2   : > { %v576_v22 = vsub.f32 1.0, %v575_v18  ;;  %v416_v23 = vmul.f32 %v1241_v47, %v415_v20  ;;  %v623_v47 = vld [vmem:[#allocation8 + $0x8] sm:$0xff] }
 0x2c3   : > { %647 = vmatpush.msra.mxu1 %v623_v47 }
 0x2c4   : > { %v577_v25 = vmul.f32 %v888_v16, %v576_v22  ;;  %777 = vmatmul.msk.f32.vlgmr.msrb.gmra.mxu2 %vm285_vm1, %v416_v23 }
 0x2c5   : > { %648 = vmatpush.msra.mxu1 %v622_v48 }
 0x2c6   : > { %v578_v28 = vadd.f32 %v888_v16, %v577_v25 }
 0x2c8   : > { %v582_v32 = vsel %vm581_vm14, %v888_v16, %v578_v28 }
 0x2c9   : > { %v587_v33 = vsel %vm584_vm2, %v586_v30, %v582_v32 }
 0x2ca   : > { %v588_v34 = vmul.f32 %v1245_v50, %v587_v33 }
 0x2cc   : > { %783 = vmatmul.msk.f32.vlgmr.msra.gmra.mxu2 %vm285_vm1, %v588_v34 }
 0x2d0   : > { %v504_v38 = vpop.permute.xlu1 %503 }
 0x2d1   : > { %524 = vmatpush.msrb.mxu3 %v504_v38 }
 0x2d2   : > { %780 = vmatmul.msk.f32.vlgmr.msrb.gmra.mxu3 %vm285_vm1, %v502_v39 }
 0x33d   : > { %v359_v40 = vpop.f32.mrf.mxu2 }
 0x33e   : > { %362 = vst.msk [vmem:[#allocation2] sm:$0xff] %vm285_vm1, %v359_v40  ;;  %vm533_vm1 = vcmask 195712  }
 0x347   : > { %v440_v41 = vpop.f32.mrf.mxu2 }
 0x348   : > { %444 = vrot.lane.b32.xlu2 %v440_v41, %s1066_s25 }
 0x34f   : > { %v612_v42 = vpop.f32.mrf.mxu2 }
 0x350   : > { %616 = vrot.lane.b32.xlu0 %v612_v42, %s1067_s12 }
 0x355   : > { %v526_v44 = vpop.f32.mrf.mxu3 }
 0x356   : > { %530 = vrot.lane.b32.xlu1 %v526_v44, %s1068_s27 }
 0x3a2   : > { %v445_v45 = vpop.permute.xlu2 %444 }
 0x3a3   : > { %448 = vst.msk [vmem:[#allocation2] sm:$0xff] %vm447_vm5, %v445_v45 }
 0x3c2   : > { %v617_v50 = vpop.permute.xlu0 %616 }
 0x3c8   : > { %v531_v49 = vpop.permute.xlu1 %530 }
 0x3c9   : > { %534 = vst.msk [vmem:[#allocation2] sm:$0xff] %vm533_vm1, %v531_v49 }
 0x3ca   : > { %620 = vst.msk [vmem:[#allocation2] sm:$0xff] %vm619_vm6, %v617_v50 }
 0x3d1   : > { %v621_v51 = vld [vmem:[#allocation2] sm:$0xff] }
 0x3d2   : > { %784 = vmatmul.msk.f32.vlgmr.msra.gmra.mxu1 %vm253_vm0, %v621_v51 }
 0x44f   : > { %v650_v53 = vpop.f32.mrf.mxu1 }
 0x450   : > { %v651_v54 = vadd.f32 %v872_v52, %v650_v53 }
 0x452   : > { %653 = vst.msk [vmem:[%s247_s6] sm:$0xff] %vm253_vm0, %v651_v54 }
 0x453   : > { %1006 = shalt.err (!%p1003_p9)
}
 0x454   : > { %799 = dma.vmem_to_hbm [thread:$0]  (%p1163_p4), %s668_s7, 128, %s670_s9, %s655_s22  }
 0x455 PF: > { %s681_s14 = sand.u32 1, %s1037_s15   ;;  %p1318_p10 = scmp.ge.s32.totalorder %s1049_s18, 2 }
 0x456   : > { %s682_s28 = scalar_lea.sflag [#allocation5], %s681_s14 }
 0x457   : > { %p813_p13 = pnand %p1318_p10, %p1167_p6 }
 0x459   : > { %p814_p11 = pneg %p813_p13 }
 0x45b   : > { %1032 = dma.done.wait (%p814_p11), %s682_s28, 128  }
 0x45c   : > { %1034 = vsyncadd (%p814_p11), %s682_s28, 4294967168  ;;  %p18_p0 = scmp.ge.s32.totalorder %s1137_s8, 4   ;;  %s1319_s15 = smov %s1041_s16 }
 0x45d   : > { %s1320_s16 = smov %s1045_s17  ;;  %s1321_s17 = smov %s1148_s11 }
 0x45e   : > { %s1322_s18 = smov %s1137_s8  ;;  %20 = sbr.rel (!%p18_p0) target bundleno = 6 (0x6), region = 89 }
 0x463   :  { %688 = vsyncpa [#allocation4], 1 }
 0x464   :  { %690 = vsyncpa [#allocation4 + $0x1], 1 }
 0x465   :  { %691 = vsyncpa [#allocation7], 1 }
 0x466   :  { %692 = vsyncpa [#allocation5], 1 }
 0x467   :  { %694 = vsyncpa [#allocation5 + $0x1], 1 }

</bundles_post_ra>
